<compile_context>
chip_gen: v6e
topology: v6e:2x2x1
jax: 0.10.0
libtpu: 0.0.40
codegen_flags: <defaults>
</compile_context>

<pallas_src>
import math
import functools

import jax
import jax.numpy as jnp
from jax.experimental import pallas as pl
from jax.experimental.pallas import tpu as pltpu


def _get_alibi_slopes(heads):
    """Same math as AlibiPositionalBias._get_slopes."""
    def slopes_power_of_2(n):
        start = 2 ** (-(2 ** (-(math.log2(n) - 3))))
        ratio = start
        return [start * ratio ** i for i in range(n)]

    if math.log2(heads).is_integer():
        return slopes_power_of_2(heads)
    closest = 2 ** math.floor(math.log2(heads))
    return (slopes_power_of_2(closest)
            + slopes_power_of_2(2 * closest)[0::2][: heads - closest])


def _round_up(x, m):
    return ((x + m - 1) // m) * m


def alibi_tile(neg_slopes, q_offset, k_offset, tq, tk):
    """One (H, tq, tk) ALiBi bias tile, computed entirely in-register.

    neg_slopes: (H, 1, 1) f32, already negated (exactly +0.0 for pad heads).
    q_offset / k_offset: scalar absolute positions of the tile origin.

    Intended for fusion into attention kernels (compute the bias inline in
    the k-loop instead of writing an (H, Q, K) tensor to HBM and re-reading
    it).  The standalone pallas_call below is just the materializing fallback.
    """
    rows = jax.lax.broadcasted_iota(jnp.int32, (tq, tk), 0)
    cols = jax.lax.broadcasted_iota(jnp.int32, (tq, tk), 1)
    delta = k_offset - q_offset                       # scalar-unit arithmetic
    dist = jnp.abs(cols - rows + delta).astype(jnp.float32)   # (tq, tk)
    return dist[None, :, :] * neg_slopes                       # (H, tq, tk)


def _alibi_kernel(neg_slopes_ref, o_ref, *, tq, tk, q_start):
    # neg_slopes_ref: (Hb, 1, 1) f32 VMEM block (pre-negated slopes)
    # o_ref:          (Hb, tq, tk) tile of the (total_heads, qlen, klen) bias
    qi = pl.program_id(1)
    ki = pl.program_id(2)
    bias = alibi_tile(neg_slopes_ref[...], qi * tq + q_start, ki * tk, tq, tk)
    o_ref[...] = bias.astype(o_ref.dtype)


def alibi_positional_bias(qlen, klen, heads, total_heads=None, *,
                          dtype=jnp.float32, tq=512, tk=1024):
    """Returns bias of shape (total_heads, qlen, klen), matching the PyTorch
    module's forward(qlen, klen)."""
    total_heads = heads if total_heads is None else total_heads
    assert total_heads >= heads

    itemsize = jnp.dtype(dtype).itemsize
    sublane = {4: 8, 2: 16, 1: 32}.get(itemsize, 8)

    # Lane-dense tiles clamped to the (rounded-up) problem size.  No output
    # padding / post-slice: Pallas masks the ragged boundary blocks itself.
    tq = _round_up(min(tq, _round_up(qlen, sublane)), sublane)
    tk = _round_up(min(tk, _round_up(klen, 128)), 128)

    # Fold several heads per grid step when the (tq, tk) tile is small, to
    # amortize the ~0.35 us per-step overhead on short sequences.  Output
    # block is capped at ~2 MiB so v7x (64 MiB VMEM) stays comfortable even
    # with double-buffered outputs.
    block_budget_elems = (2 * 1024 * 1024) // itemsize
    hb = max(1, min(total_heads, block_budget_elems // (tq * tk)))
    while total_heads % hb:
        hb -= 1

    # Pre-negated slopes; un-alibied pad heads get exactly +0.0 (matches
    # pad_at_dim zero padding, avoids the -0.0 artifact).
    neg_slopes = [-s for s in _get_alibi_slopes(heads)]
    neg_slopes += [0.0] * (total_heads - heads)
    neg_slopes = jnp.asarray(neg_slopes, jnp.float32).reshape(total_heads, 1, 1)

    grid = (total_heads // hb, pl.cdiv(qlen, tq), pl.cdiv(klen, tk))
    kernel = functools.partial(_alibi_kernel, tq=tq, tk=tk, q_start=klen - qlen)

    return pl.pallas_call(
        kernel,
        out_shape=jax.ShapeDtypeStruct((total_heads, qlen, klen), dtype),
        grid_spec=pltpu.PrefetchScalarGridSpec(
            num_scalar_prefetch=0,
            grid=grid,
            in_specs=[
                pl.BlockSpec((hb, 1, 1), lambda h, qi, ki: (h, 0, 0)),
            ],
            out_specs=pl.BlockSpec((hb, tq, tk), lambda h, qi, ki: (h, qi, ki)),
        ),
        compiler_params=pltpu.CompilerParams(
            dimension_semantics=("parallel", "parallel", "parallel")),
        cost_estimate=pl.CostEstimate(
            flops=4 * total_heads * qlen * klen,
            transcendentals=0,
            bytes_accessed=total_heads * qlen * klen * itemsize
                           + total_heads * 4),
    )(neg_slopes)


if __name__ == "__main__":
    # ALiBi's forward takes no tensor inputs (bias is a pure function of
    # qlen/klen/heads); the key only satisfies the determinism convention.
    _ = jax.random.PRNGKey(0)

    def reference(qlen, klen, heads, total_heads):
        # Pure-JAX reference: same math as the PyTorch forward.
        slopes = jnp.asarray(_get_alibi_slopes(heads), jnp.float32)
        seq = jnp.arange(klen - qlen, klen)
        ctx = jnp.arange(klen)
        b = -jnp.abs(ctx[None, None, :] - seq[None, :, None]).astype(jnp.float32)
        b = b * slopes[:, None, None]
        return jnp.pad(b, ((0, total_heads - heads), (0, 0), (0, 0)))

    # AlibiPositionalBias(heads=4, total_heads=8); forward(qlen=8, klen=16).
    heads, total_heads, qlen, klen = 4, 8, 8, 16
    out = jax.block_until_ready(
        alibi_positional_bias(qlen, klen, heads, total_heads))
    ref = reference(qlen, klen, heads, total_heads)
    assert out.shape == (total_heads, qlen, klen)
    assert jnp.allclose(out, ref, atol=1e-6, rtol=1e-6)

    # Ragged (non tile-aligned) shapes exercise the masked boundary blocks
    # that replaced the pad-then-slice second HBM pass.
    q2, k2 = 13, 300
    out2 = jax.block_until_ready(
        alibi_positional_bias(q2, k2, heads, total_heads))
    ref2 = reference(q2, k2, heads, total_heads)
    assert out2.shape == (total_heads, q2, k2)
    assert jnp.allclose(out2, ref2, atol=1e-6, rtol=1e-6)

    # bf16 output path (halves writeback bytes; compute stays f32).
    out3 = jax.block_until_ready(
        alibi_positional_bias(q2, k2, heads, total_heads, dtype=jnp.bfloat16))
    assert jnp.allclose(out3.astype(jnp.float32), ref2, atol=1e-2, rtol=1e-2)

    # TODO(synk): the PyTorch module caches `bias` via register_buffer and
    # returns a slice on later calls with smaller qlen/klen; that host-side
    # caching is left to the caller (re-invoke or slice the returned array).
    # For real workloads, prefer fusing `alibi_tile` into the attention
    # kernel instead of materializing the (H, Q, K) tensor at all.

    print("KERNEL_OK")
</pallas_src>

<mosaic_0001>
module attributes {stable_mosaic.version = 11 : i64} {
  func.func @_alibi_kernel(%arg0: i32, %arg1: i32, %arg2: i32, %arg3: memref<8x1x1xf32, #tpu.memory_space<vmem>>, %arg4: memref<8x8x128xf32, #tpu.memory_space<vmem>>) attributes {dimension_semantics = [#tpu.dimension_semantics<parallel>, #tpu.dimension_semantics<parallel>, #tpu.dimension_semantics<parallel>], iteration_bounds = array<i64: 1, 1, 1>, scalar_prefetch = 0 : i64, scratch_operands = 0 : i64, tpu.core_type = #tpu.core_type<tc>, window_params = [{transform_indices = @transform_0, window_bounds = array<i64: 8, 1, 1>}, {transform_indices = @transform_1, window_bounds = array<i64: 8, 8, 128>}]} {
    %c0 = arith.constant 0 : index
    %c0_0 = arith.constant 0 : index
    %c0_1 = arith.constant 0 : index
    %0 = vector.load %arg3[%c0, %c0_0, %c0_1] : memref<8x1x1xf32, #tpu.memory_space<vmem>>, vector<8x1x1xf32>
    %c8_i32 = arith.constant 8 : i32
    %1 = arith.muli %arg1, %c8_i32 : i32
    %c8_i32_2 = arith.constant 8 : i32
    %2 = arith.addi %1, %c8_i32_2 : i32
    %c128_i32 = arith.constant 128 : i32
    %3 = arith.muli %arg2, %c128_i32 : i32
    %4 = tpu.iota {dimensions = array<i32: 0>} : vector<8x128xi32>
    %5 = tpu.iota {dimensions = array<i32: 1>} : vector<8x128xi32>
    %6 = arith.subi %3, %2 : i32
    %7 = arith.subi %5, %4 : vector<8x128xi32>
    %8 = vector.broadcast %6 : i32 to vector<8x128xi32>
    %9 = arith.addi %7, %8 : vector<8x128xi32>
    %10 = math.absi %9 : vector<8x128xi32>
    %11 = arith.sitofp %10 : vector<8x128xi32> to vector<8x128xf32>
    %12 = vector.shape_cast %11 : vector<8x128xf32> to vector<1x8x128xf32>
    %13 = vector.broadcast %12 : vector<1x8x128xf32> to vector<8x8x128xf32>
    %14 = vector.broadcast %0 : vector<8x1x1xf32> to vector<8x8x128xf32>
    %15 = arith.mulf %13, %14 : vector<8x8x128xf32>
    %c0_3 = arith.constant 0 : index
    %c0_4 = arith.constant 0 : index
    %c0_5 = arith.constant 0 : index
    %16 = vector.load %arg4[%c0_3, %c0_4, %c0_5] : memref<8x8x128xf32, #tpu.memory_space<vmem>>, vector<8x8x128xf32>
    tpu.vector_store %arg4[%c0_3, %c0_4, %c0_5], %15 {strides = array<i32>} : memref<8x8x128xf32, #tpu.memory_space<vmem>>, vector<8x8x128xf32>,
    return
  }
  func.func @transform_0(%arg0: i32, %arg1: i32, %arg2: i32) -> (i32, i32, i32) {
    %c0_i32 = arith.constant 0 : i32
    %c0_i32_0 = arith.constant 0 : i32
    %c0_i32_1 = arith.constant 0 : i32
    return %arg0, %c0_i32, %c0_i32_0 : i32, i32, i32
  }
  func.func @transform_1(%arg0: i32, %arg1: i32, %arg2: i32) -> (i32, i32, i32) {
    %c0_i32 = arith.constant 0 : i32
    return %arg0, %arg1, %arg2 : i32, i32, i32
  }
}

</mosaic_0001>

<bundles_post_ra>
// kernel: tpu_custom_call.1
= control target key start
LH: loop header
LB: loop body
LE: loop exit
PB: predicated region body
PF: predicated region fallthrough
CT: control target
= control target key end

     0   :  { %v173_v2 = vmov 0   ;;  %s214_s0 = inlined_call_operand.vmem [shape: f32[8,1,1], index: 0, kind: input, shape index: {}]   ;;  %s215_s1 = inlined_call_operand.hbm [shape: f32[8,8,16], index: 1, kind: output, shape index: {}]  }
   0x1   :  { %v139_v0 = vld [vmem:[%s214_s0 + $0x2] ss:$0 sm:$0xff]  ;;  %v137_v1 = vld [vmem:[%s214_s0] ss:$0 sm:$0xff]  ;;  %150 = vset.pattern.permute.xlu1 %v173_v2  ;;  %149 = vset.pattern.permute.xlu0 %v173_v2  ;;  %v140_v3 = vld [vmem:[%s214_s0 + $0x3] ss:$0 sm:$0xff] }
   0x2   :  { %81 = vperm.xlu1 %150, %v139_v0   ;;  %73 = vperm.xlu0 %149, %v137_v1   ;;  %v138_v4 = vld [vmem:[%s214_s0 + $0x1] ss:$0 sm:$0xff] }
   0x3   :  { %6 = vsyncpa [#allocation3], 0  ;;  %v142_v5 = vld [vmem:[%s214_s0 + $0x5] ss:$0 sm:$0xff]  ;;  %v141_v6 = vld [vmem:[%s214_s0 + $0x4] ss:$0 sm:$0xff]  ;;  %v20_v9 = vlaneseq }
   0x4   :  { %v144_v7 = vld [vmem:[%s214_s0 + $0x7] ss:$0 sm:$0xff]  ;;  %v143_v8 = vld [vmem:[%s214_s0 + $0x6] ss:$0 sm:$0xff]  ;;  %s174_s0 = smov [#allocation2]  }
   0x5   :  { %v21_v10 = vshrl.u32 %v20_v9, 7  ;;  %v23_v11 = vand.u32 127, %v20_v9  ;;  %s125_s22 = sshll.u32 %s174_s0, 4  ;;  %s126_s22 = int_to_ptr.vmem [resolvable:$true] %s125_s22 }
   0x6   :  { %85 = vperm.xlu1 %150, %v140_v3   ;;  %77 = vperm.xlu0 %149, %v138_v4   ;;  %s151_s23 = scalar_lea.vmem %s126_s22, 1024  ;;  %p156_p1 = scmp.lt.s32.totalorder %s126_s22, %s126_s22 }
   0x7   :  { %v25_v12 = vsub.s32 %v23_v11, %v21_v10  ;;  %p152_p0 = scmp.ne.s32.totalorder %s126_s22, %s151_s23  ;;  %p157_p2 = scmp.lt.s32.totalorder %s151_s23, %s151_s23 }
   0x9   :  { %v27_v13 = vadd.s32 4294967288, %v25_v12  ;;  %p158_p3 = por %p157_p2, %p156_p1 }
   0xa   :  { %93 = vperm.xlu1 %150, %v142_v5   ;;  %89 = vperm.xlu0 %149, %v141_v6  }
   0xb   :  { %v29_v14 = vsub.s32 0, %v27_v13  ;;  %p159_p4 = pnand %p158_p3, %p152_p0 }
   0xd   :  { %v136_v15 = vmin.u32 %v29_v14, %v27_v13 }
   0xe   :  { %101 = vperm.xlu1 %150, %v144_v7   ;;  %97 = vperm.xlu0 %149, %v143_v8  }
   0xf   :  { %v31_v16 = vcvt.s32.f32 %v136_v15 }
  0x7d   :  { %v82_v17 = vpop.permute.xlu1 %81  ;;  %v74_v18 = vpop.permute.xlu0 %73 }
  0x7e   :  { %v106_v19 = vmul.f32 %v82_v17, %v31_v16  ;;  %v104_v20 = vmul.f32 %v74_v18, %v31_v16 }
  0x80   :  { %114 = vst [vmem:[#allocation2 + $0x10] sm:$0xff] %v106_v19  ;;  %112 = vst [vmem:[#allocation2] sm:$0xff] %v104_v20 }
  0x81   :  { %v86_v21 = vpop.permute.xlu1 %85  ;;  %v78_v22 = vpop.permute.xlu0 %77 }
  0x82   :  { %v107_v23 = vmul.f32 %v86_v21, %v31_v16  ;;  %v105_v24 = vmul.f32 %v78_v22, %v31_v16 }
  0x84   :  { %115 = vst [vmem:[#allocation2 + $0x18] sm:$0xff] %v107_v23  ;;  %113 = vst [vmem:[#allocation2 + $0x8] sm:$0xff] %v105_v24 }
  0x85   :  { %v94_v25 = vpop.permute.xlu1 %93  ;;  %v90_v26 = vpop.permute.xlu0 %89 }
  0x86   :  { %v109_v27 = vmul.f32 %v94_v25, %v31_v16  ;;  %v108_v28 = vmul.f32 %v90_v26, %v31_v16 }
  0x88   :  { %117 = vst [vmem:[#allocation2 + $0x28] sm:$0xff] %v109_v27  ;;  %116 = vst [vmem:[#allocation2 + $0x20] sm:$0xff] %v108_v28 }
  0x89   :  { %v102_v29 = vpop.permute.xlu1 %101  ;;  %v98_v30 = vpop.permute.xlu0 %97 }
  0x8a   :  { %v111_v31 = vmul.f32 %v102_v29, %v31_v16  ;;  %v110_v32 = vmul.f32 %v98_v30, %v31_v16 }
  0x8c   :  { %119 = vst [vmem:[#allocation2 + $0x38] sm:$0xff] %v111_v31  ;;  %118 = vst [vmem:[#allocation2 + $0x30] sm:$0xff] %v110_v32 }
  0x8d   :  { %162 = shalt.err (!%p159_p4)
}
  0x8e   :  { %s175_s24 = smov 128   ;;  %s176_s25 = smov 8  }
  0x8f   :  { %131 = dma.vmem_to_hbm [thread:$0]  %s126_s22, 1024, %s215_s1, [#allocation3], %s175_s24, %s175_s24, %s176_s25  }
  0x90   :  { %171 = dma.done.wait [#allocation3], 1024  }
  0x91   :  { %172 = vsyncadd [#allocation3], 4294966272 }
  0x92   :  { %135 = vsyncpa [#allocation3], 1 }

</bundles_post_ra>
